<compile_context>
chip_gen: v7x
topology: tpu7x:2x2x1
jax: 0.10.0
libtpu: 0.0.40
codegen_flags: <defaults>
</compile_context>

<pallas_src>
import jax
import jax.numpy as jnp
from jax.experimental import pallas as pl
from jax.experimental.pallas import tpu as pltpu


def _round_up(x, m):
    return ((x + m - 1) // m) * m


def roberta_intermediate_kernel(x_ref, w_ref, b_ref, o_ref):
    # x_ref: (tm, H)  compute dtype (bf16 by default)
    # w_ref: (H,  tn) compute dtype
    # b_ref: (1,  tn) f32
    # o_ref: (tm, tn) output dtype
    h = jnp.dot(x_ref[...], w_ref[...], preferred_element_type=jnp.float32)
    h = h + b_ref[...]
    # GELU (tanh approximation) — tanh lowers to the EUP on all generations.
    # TODO(synk): exact erf-based GELU to bit-match HF ACT2FN["gelu"].
    y = jax.nn.gelu(h, approximate=True)
    o_ref[...] = y.astype(o_ref.dtype)


def roberta_intermediate(hidden_states, w_t, bias, *, tm=None, tn=None,
                         compute_dtype=jnp.bfloat16):
    """Fused dense(H->I) + GELU.

    hidden_states: [..., H]
    w_t:           [H, I]  (PyTorch nn.Linear weight, transposed once outside)
    bias:          [I]
    """
    *lead, H = hidden_states.shape
    Hw, I = w_t.shape
    assert Hw == H and bias.shape == (I,)
    M = 1
    for d in lead:
        M *= d
    out_dtype = hidden_states.dtype

    # ---- tiling ---------------------------------------------------------
    if tm is None:
        tm = 512                                  # 256-1024 sweet spot
    tm = _round_up(max(8, min(tm, _round_up(M, 8))), 8)
    M_pad = _round_up(M, tm)

    if tn is None:
        tn = I                                    # whole intermediate dim
    assert I % tn == 0 and (tn % 128 == 0 or tn == I)

    # ---- operands: bf16 feeds the MXU at full rate, f32 accumulation ----
    x2d = hidden_states.reshape(M, H).astype(compute_dtype)
    if M_pad != M:
        x2d = jnp.pad(x2d, ((0, M_pad - M), (0, 0)))
    w2d = w_t.astype(compute_dtype)
    b2d = bias.astype(jnp.float32).reshape(1, I)

    # ---- explicit VMEM budget (double-buffered streamed tiles) ----------
    in_b = jnp.dtype(compute_dtype).itemsize
    out_b = jnp.dtype(out_dtype).itemsize
    need = 2 * (tm * H * in_b + H * tn * in_b + tn * 4 + tm * tn * out_b)
    vmem_limit = int(min(max(2 * need, 16 * 1024 * 1024), 48 * 1024 * 1024))

    grid = (M_pad // tm, I // tn)

    out2d = pl.pallas_call(
        roberta_intermediate_kernel,
        out_shape=jax.ShapeDtypeStruct((M_pad, I), out_dtype),
        grid_spec=pltpu.PrefetchScalarGridSpec(
            num_scalar_prefetch=0,
            grid=grid,
            in_specs=[
                pl.BlockSpec((tm, H), lambda i, j: (i, 0)),   # activation rows
                pl.BlockSpec((H, tn), lambda i, j: (0, j)),   # W^T columns
                pl.BlockSpec((1, tn), lambda i, j: (0, j)),   # bias
            ],
            out_specs=pl.BlockSpec((tm, tn), lambda i, j: (i, j)),
        ),
        compiler_params=pltpu.CompilerParams(
            dimension_semantics=("parallel", "parallel"),
            vmem_limit_bytes=vmem_limit),
    )(x2d, w2d, b2d)

    out2d = out2d[:M]
    return out2d.reshape(*lead, I)


def reference(hidden_states, w_t, bias):
    h = jnp.einsum("...h,hi->...i", hidden_states.astype(jnp.float32),
                   w_t.astype(jnp.float32)) + bias.astype(jnp.float32)
    return jax.nn.gelu(h, approximate=True)


if __name__ == "__main__":
    # Small config: batch=2, seq=8, hidden_size=32, intermediate_size=128
    B, S, H, I = 2, 8, 32, 128

    key = jax.random.PRNGKey(0)
    k1, k2, k3 = jax.random.split(key, 3)

    hidden_states = jax.random.normal(k1, (B, S, H), dtype=jnp.float32)
    # Deterministic synthetic parameters (nn.Linear weight stored as [I, H]
    # in PyTorch; we pass the transpose [H, I]).
    w_t = jax.random.normal(k2, (H, I), dtype=jnp.float32) * 0.02
    bias = jax.random.normal(k3, (I,), dtype=jnp.float32) * 0.02

    out = roberta_intermediate(hidden_states, w_t, bias)
    out = jax.block_until_ready(out)

    ref = reference(hidden_states, w_t, bias)
    assert out.shape == (B, S, I)
    # bf16 MXU operands with f32 accumulation -> loose tolerance vs f32 ref.
    err = jnp.max(jnp.abs(out.astype(jnp.float32) - ref))
    assert jnp.allclose(out.astype(jnp.float32), ref, atol=2e-2, rtol=2e-2), float(err)

    print("KERNEL_OK")
</pallas_src>

<mosaic_0001>
module attributes {stable_mosaic.version = 11 : i64} {
  func.func @roberta_intermediate_kernel(%arg0: i32, %arg1: i32, %arg2: memref<16x32xbf16, #tpu.memory_space<vmem>>, %arg3: memref<32x128xbf16, #tpu.memory_space<vmem>>, %arg4: memref<1x128xf32, #tpu.memory_space<vmem>>, %arg5: memref<16x128xf32, #tpu.memory_space<vmem>>) attributes {dimension_semantics = [#tpu.dimension_semantics<parallel>, #tpu.dimension_semantics<parallel>], iteration_bounds = array<i64: 1, 1>, scalar_prefetch = 0 : i64, scratch_operands = 0 : i64, tpu.core_type = #tpu.core_type<tc>, window_params = [{transform_indices = @transform_0, window_bounds = array<i64: 16, 32>}, {transform_indices = @transform_1, window_bounds = array<i64: 32, 128>}, {transform_indices = @transform_2, window_bounds = array<i64: 1, 128>}, {transform_indices = @transform_3, window_bounds = array<i64: 16, 128>}]} {
    %c0 = arith.constant 0 : index
    %c0_0 = arith.constant 0 : index
    %0 = vector.load %arg2[%c0, %c0_0] : memref<16x32xbf16, #tpu.memory_space<vmem>>, vector<16x32xbf16>
    %c0_1 = arith.constant 0 : index
    %c0_2 = arith.constant 0 : index
    %1 = vector.load %arg3[%c0_1, %c0_2] : memref<32x128xbf16, #tpu.memory_space<vmem>>, vector<32x128xbf16>
    %cst = arith.constant dense<0.000000e+00> : vector<16x128xf32>
    %2 = tpu.matmul %0, %1, %cst {dimension_numbers = #tpu.dot_dimension_numbers<[1], [0], [0], [1], [0, 0, 1, 1], [], []>} : vector<16x32xbf16>, vector<32x128xbf16>, vector<16x128xf32> -> vector<16x128xf32>
    %c0_3 = arith.constant 0 : index
    %c0_4 = arith.constant 0 : index
    %3 = vector.load %arg4[%c0_3, %c0_4] : memref<1x128xf32, #tpu.memory_space<vmem>>, vector<1x128xf32>
    %4 = vector.broadcast %3 : vector<1x128xf32> to vector<16x128xf32>
    %5 = arith.addf %2, %4 : vector<16x128xf32>
    %6 = arith.mulf %5, %5 : vector<16x128xf32>
    %7 = arith.mulf %5, %6 : vector<16x128xf32>
    %cst_5 = arith.constant 4.471500e-02 : f32
    %8 = vector.broadcast %cst_5 : f32 to vector<16x128xf32>
    %9 = arith.mulf %8, %7 : vector<16x128xf32>
    %10 = arith.addf %5, %9 : vector<16x128xf32>
    %cst_6 = arith.constant 0.797884583 : f32
    %11 = vector.broadcast %cst_6 : f32 to vector<16x128xf32>
    %12 = arith.mulf %11, %10 : vector<16x128xf32>
    %13 = math.tanh %12 : vector<16x128xf32>
    %cst_7 = arith.constant 1.000000e+00 : f32
    %14 = vector.broadcast %cst_7 : f32 to vector<16x128xf32>
    %15 = arith.addf %14, %13 : vector<16x128xf32>
    %cst_8 = arith.constant 5.000000e-01 : f32
    %16 = vector.broadcast %cst_8 : f32 to vector<16x128xf32>
    %17 = arith.mulf %16, %15 : vector<16x128xf32>
    %18 = arith.mulf %5, %17 : vector<16x128xf32>
    %c0_9 = arith.constant 0 : index
    %c0_10 = arith.constant 0 : index
    %19 = vector.load %arg5[%c0_9, %c0_10] : memref<16x128xf32, #tpu.memory_space<vmem>>, vector<16x128xf32>
    tpu.vector_store %arg5[%c0_9, %c0_10], %18 {strides = array<i32>} : memref<16x128xf32, #tpu.memory_space<vmem>>, vector<16x128xf32>,
    return
  }
  func.func @transform_0(%arg0: i32, %arg1: i32) -> (i32, i32) {
    %c0_i32 = arith.constant 0 : i32
    %c0_i32_0 = arith.constant 0 : i32
    return %arg0, %c0_i32 : i32, i32
  }
  func.func @transform_1(%arg0: i32, %arg1: i32) -> (i32, i32) {
    %c0_i32 = arith.constant 0 : i32
    %c0_i32_0 = arith.constant 0 : i32
    return %c0_i32, %arg1 : i32, i32
  }
  func.func @transform_2(%arg0: i32, %arg1: i32) -> (i32, i32) {
    %c0_i32 = arith.constant 0 : i32
    %c0_i32_0 = arith.constant 0 : i32
    return %c0_i32, %arg1 : i32, i32
  }
  func.func @transform_3(%arg0: i32, %arg1: i32) -> (i32, i32) {
    %c0_i32 = arith.constant 0 : i32
    return %arg0, %arg1 : i32, i32
  }
}

</mosaic_0001>

<bundles_post_ra>
// kernel: tpu_custom_call.1
= control target key start
LH: loop header
LB: loop body
LE: loop exit
PB: predicated region body
PF: predicated region fallthrough
CT: control target
= control target key end

     0   :  { %8 = vsyncpa [#allocation3], 0  ;;  %s329_s0 = inlined_call_operand.hbm [shape: bf16[16,32], index: 0, kind: input, shape index: {}]   ;;  %s330_s1 = inlined_call_operand.hbm [shape: bf16[32,128], index: 1, kind: input, shape index: {}]   ;;  %s331_s2 = inlined_call_operand.vmem [shape: f32[1,128], index: 2, kind: input, shape index: {}]   ;;  %s332_s3 = inlined_call_operand.hbm [shape: f32[16,128], index: 3, kind: output, shape index: {}]  }
   0x1   :  { %9 = vsyncpa [#allocation6], 0 }
   0x2   :  { %10 = vsyncpa [#allocation4], 0  ;;  %s261_s12 = smov [#allocation2]   ;;  %s189_s16 = scalar_lea.hbm %s329_s0, 128 }
   0x3   :  { %s16_s13 = sshll.u32 %s261_s12, 4  ;;  %p190_p0 = scmp.ne.s32.totalorder %s329_s0, %s189_s16  ;;  %s17_s13 = int_to_ptr.vmem [resolvable:$true] %s16_s13 }
   0x4   :  { %p193_p1 = scmp.lt.u32.totalorder %s189_s16, %s329_s0 }
   0x6   :  { %p195_p2 = pnand %p193_p1, %p190_p0 }
   0x8   :  { %198 = shalt.err (!%p195_p2)
}
   0x9   :  { %s199_s21 = scalar_lea.vmem %s17_s13, 128  ;;  %p204_p4 = scmp.lt.s32.totalorder %s17_s13, %s17_s13 }
   0xa   :  { %p200_p3 = scmp.ne.s32.totalorder %s17_s13, %s199_s21  ;;  %p205_p5 = scmp.lt.s32.totalorder %s199_s21, %s199_s21 }
   0xc   :  { %p206_p6 = por %p205_p5, %p204_p4 }
   0xe   :  { %p207_p7 = pnand %p206_p6, %p200_p3 }
  0x10   :  { %210 = shalt.err (!%p207_p7)
}
  0x11   :  { %s262_s22 = smov 64   ;;  %s263_s23 = smov 4  }
  0x12   :  { %22 = dma.hbm_to_vmem [thread:$0]  %s329_s0, 128, %s17_s13, [#allocation3], %s262_s22, %s262_s22, %s263_s23  }
  0x13   :  { %s264_s26 = smov [#allocation5]   ;;  %s211_s30 = scalar_lea.hbm %s330_s1, 256 }
  0x14   :  { %s28_s27 = sshll.u32 %s264_s26, 4  ;;  %p212_p8 = scmp.ne.s32.totalorder %s330_s1, %s211_s30  ;;  %s29_s27 = int_to_ptr.vmem [resolvable:$true] %s28_s27 }
  0x15   :  { %p215_p9 = scmp.lt.u32.totalorder %s211_s30, %s330_s1 }
  0x17   :  { %p217_p10 = pnand %p215_p9, %p212_p8 }
  0x19   :  { %220 = shalt.err (!%p217_p10)
}
  0x1a   :  { %s221_s8 = scalar_lea.vmem %s29_s27, 256  ;;  %p226_p12 = scmp.lt.s32.totalorder %s29_s27, %s29_s27 }
  0x1b   :  { %p222_p11 = scmp.ne.s32.totalorder %s29_s27, %s221_s8  ;;  %p227_p13 = scmp.lt.s32.totalorder %s221_s8, %s221_s8 }
  0x1d   :  { %p228_p0 = por %p227_p13, %p226_p12 }
  0x1f   :  { %p229_p1 = pnand %p228_p0, %p222_p11 }
  0x21   :  { %232 = shalt.err (!%p229_p1)
}
  0x22   :  { %34 = dma.hbm_to_vmem [thread:$0]  %s330_s1, 256, %s29_s27, [#allocation6], %s262_s22, %s262_s22, %s263_s23  }
  0x23   :  { %255 = dma.done.wait [#allocation3], 128  }
  0x24   :  { %256 = vsyncadd [#allocation3], 4294967168 }
  0x25   :  { %257 = dma.done.wait [#allocation6], 256  }
  0x26   :  { %258 = vsyncadd [#allocation6], 4294967040  ;;  %v265_v0 = vmov 0.0   ;;  %vm266_vm0 = vmmov 0   ;;  %v182_v1 = vld [vmem:[#allocation5] sm:$0xff]   ;;  %v183_v2 = vld [vmem:[#allocation5 + $0x8] sm:$0xff]  }
  0x27   :  { %165 = vmatprep.subr.bf16.mxu0 %v265_v0  ;;  %169 = vmatprep.mubr.msk.bf16.mxu0 %vm266_vm0, %v265_v0  ;;  %v184_v3 = vld [vmem:[#allocation2] sm:$0xff]   ;;  %vm74_vm1 = vcmask 261120   ;;  %s267_s1 = smov [#allocation7]  }
  0x28   :  { %166 = vmatpush3.bf16.msra.mxu0 %v182_v1  ;;  %v157_v4 = vld [vmem:[%s331_s2] ss:$0 sm:$0xff]  ;;  %s144_s2 = sshll.u32 %s267_s1, 4  ;;  %s145_s2 = int_to_ptr.vmem [resolvable:$true] %s144_s2 }
  0x29   :  { %167 = vmatprep.subr.bf16.mxu0 %v265_v0  ;;  %s233_s12 = scalar_lea.vmem %s145_s2, 256  ;;  %p238_p3 = scmp.lt.s32.totalorder %s145_s2, %s145_s2 }
  0x2a   :  { %p234_p2 = scmp.ne.s32.totalorder %s145_s2, %s233_s12  ;;  %p239_p4 = scmp.lt.s32.totalorder %s233_s12, %s233_s12 }
  0x2c   :  { %168 = vmatpush3.bf16.msra.mxu0 %v183_v2  ;;  %p240_p5 = por %p239_p4, %p238_p3 }
  0x2e   :  { %p241_p6 = pnand %p240_p5, %p234_p2 }
  0x2f   :  { %170 = vmatmul.mubr.msk.bf16.vlgmr.msra.gmra.mrb[0].mxu0 %vm74_vm1, %v184_v3 }
 0x102   :  { %v112_v5 = vpop.f32.mrb[0].mxu0 }
 0x103   :  { %v113_v6 = vadd.f32 %v157_v4, %v112_v5  ;;  %v171_v7 = vpop.f32.mrb[1].mxu0 }
 0x104   :  { %v115_v8 = vpop.f32.mrb[2].mxu0 }
 0x105   :  { %v119_v9 = vmul.f32 %v113_v6, %v113_v6  ;;  %v116_v10 = vadd.f32 %v157_v4, %v115_v8  ;;  %v172_v11 = vpop.f32.mrb[3].mxu0 }
 0x107   :  { %v121_v12 = vmul.f32 %v119_v9, %v113_v6  ;;  %v120_v13 = vmul.f32 %v116_v10, %v116_v10 }
 0x109   :  { %v123_v14 = vmul.f32 0.044715, %v121_v12  ;;  %v122_v15 = vmul.f32 %v120_v13, %v116_v10 }
 0x10b   :  { %v125_v16 = vadd.f32 %v123_v14, %v113_v6  ;;  %v124_v17 = vmul.f32 0.044715, %v122_v15 }
 0x10d   :  { %v127_v18 = vmul.f32 0.7978846, %v125_v16  ;;  %v126_v19 = vadd.f32 %v124_v17, %v116_v10 }
 0x10f   :  { %185 = vtanh.f32 %v127_v18  ;;  %v128_v20 = vmul.f32 0.7978846, %v126_v19 }
 0x111   :  { %187 = vtanh.f32 %v128_v20 }
 0x119   :  { %v186_v21 = vpop.eup %185 }
 0x11a   :  { %v131_v22 = vadd.f32 1.0, %v186_v21 }
 0x11b   :  { %v188_v23 = vpop.eup %187 }
 0x11c   :  { %v133_v24 = vmul.f32 0.5, %v131_v22  ;;  %v132_v25 = vadd.f32 1.0, %v188_v23 }
 0x11e   :  { %v135_v26 = vmul.f32 %v133_v24, %v113_v6  ;;  %v134_v27 = vmul.f32 0.5, %v132_v25 }
 0x120   :  { %137 = vst [vmem:[#allocation7] sm:$0xff] %v135_v26  ;;  %v136_v28 = vmul.f32 %v134_v27, %v116_v10 }
 0x122   :  { %138 = vst [vmem:[#allocation7 + $0x8] sm:$0xff] %v136_v28 }
 0x123   :  { %244 = shalt.err (!%p241_p6)
}
 0x124   :  { %s245_s15 = scalar_lea.hbm %s332_s3, 256 }
 0x125   :  { %p246_p7 = scmp.ne.s32.totalorder %s332_s3, %s245_s15  ;;  %p249_p8 = scmp.lt.u32.totalorder %s245_s15, %s332_s3 }
 0x127   :  { %p251_p9 = pnand %p249_p8, %p246_p7 }
 0x129   :  { %254 = shalt.err (!%p251_p9)
}
 0x12a   :  { %s268_s20 = smov 128   ;;  %s269_s21 = smov 8  }
 0x12b   :  { %150 = dma.vmem_to_hbm [thread:$0]  %s145_s2, 256, %s332_s3, [#allocation4], %s268_s20, %s268_s20, %s269_s21  }
 0x12c   :  { %259 = dma.done.wait [#allocation4], 256  }
 0x12d   :  { %260 = vsyncadd [#allocation4], 4294967040 }
 0x12e   :  { %154 = vsyncpa [#allocation3], 1 }
 0x12f   :  { %155 = vsyncpa [#allocation6], 1 }
 0x130   :  { %156 = vsyncpa [#allocation4], 1 }

</bundles_post_ra>
